<compile_context>
chip_gen: v6e
topology: v6e:2x2x1
jax: 0.10.0
libtpu: 0.0.40
codegen_flags: <defaults>
</compile_context>

<pallas_src>
import jax
import jax.numpy as jnp
from jax.experimental import pallas as pl
from jax.experimental.pallas import tpu as pltpu


def encoder_kernel(x_ref, w_ref, b_ref, o_ref):
    # x_ref: [IN_F, TB]  f32, VMEM (batch along lanes)
    # w_ref: [IN_F, OUT_F] f32, SMEM (scalar reads)
    # b_ref: [OUT_F]       f32, SMEM (scalar reads)
    # o_ref: [OUT_F, TB]   f32, VMEM (lane-dense output)
    in_f = x_ref.shape[0]
    out_f = o_ref.shape[0]

    x = x_ref[...]  # load the whole tile once: [in_f, TB]

    # Fully unrolled VPU multiply-add: 12 scalar-broadcast vector FMAs + ReLU.
    for j in range(out_f):
        acc = x[0:1, :] * w_ref[0, j]
        for k in range(1, in_f):
            acc = acc + x[k:k + 1, :] * w_ref[k, j]
        o_ref[j:j + 1, :] = jnp.maximum(acc + b_ref[j], 0.0)


def encoder_forward(x, w, b, *, tb=512):
    """x: [B, 4] f32, w: [4, 3] f32 (in x out), b: [3] f32 -> [B, 3] f32."""
    B, in_f = x.shape
    out_f = w.shape[1]

    # Lane-dense layout: batch goes on the last (lane) axis.  Pad the batch up
    # to a whole number of 128-lane-aligned tiles; padded rows are sliced away
    # after the call.
    tb = max(128, min(tb, pl.cdiv(B, 128) * 128))  # tile = 128..512 lanes
    Bp = pl.cdiv(B, tb) * tb
    xt = jnp.pad(x, ((0, Bp - B), (0, 0))).T       # [in_f, Bp]  (layout plumbing)

    out_t = pl.pallas_call(
        encoder_kernel,
        out_shape=jax.ShapeDtypeStruct((out_f, Bp), jnp.float32),
        grid_spec=pl.GridSpec(
            grid=(Bp // tb,),
            in_specs=[
                # x tile: [in_f, tb], new batch tile each grid step (VMEM).
                pl.BlockSpec((in_f, tb), lambda i: (0, i)),
                # Tiny weight & bias: whole-array, resident in SMEM.
                pl.BlockSpec(memory_space=pltpu.MemorySpace.SMEM),
                pl.BlockSpec(memory_space=pltpu.MemorySpace.SMEM),
            ],
            out_specs=pl.BlockSpec((out_f, tb), lambda i: (0, i)),
        ),
        compiler_params=pltpu.CompilerParams(
            # Batch tiles are independent -> shard across TCs on v7x.
            dimension_semantics=("parallel",),
        ),
    )(xt, w, b)

    return out_t[:, :B].T


def reference_forward(x, w, b):
    return jnp.maximum(x @ w + b[None, :], 0.0)


if __name__ == "__main__":
    key = jax.random.PRNGKey(0)
    kx, kw, kb = jax.random.split(key, 3)

    B, IN_F, OUT_F = 8, 4, 3

    # Deterministic synthetic parameters (shapes from nn.Linear(4, 3)).
    # PyTorch stores weight as [3, 4]; we store its transpose [4, 3].
    w = jax.random.normal(kw, (IN_F, OUT_F), dtype=jnp.float32) * 0.5
    b = jax.random.normal(kb, (OUT_F,), dtype=jnp.float32) * 0.1
    x = jax.random.normal(kx, (B, IN_F), dtype=jnp.float32)

    out = jax.block_until_ready(encoder_forward(x, w, b))
    ref = reference_forward(x, w, b)

    assert out.shape == (B, OUT_F)
    assert jnp.allclose(out, ref, atol=1e-5, rtol=1e-5), "mismatch vs reference"

    print("KERNEL_OK")
</pallas_src>

<mosaic_0001>
module attributes {stable_mosaic.version = 11 : i64} {
  func.func @encoder_kernel(%arg0: i32, %arg1: memref<4x128xf32, #tpu.memory_space<vmem>>, %arg2: memref<4x3xf32, #tpu.memory_space<smem>>, %arg3: memref<3xf32, #tpu.memory_space<smem>>, %arg4: memref<3x128xf32, #tpu.memory_space<vmem>>) attributes {dimension_semantics = [#tpu.dimension_semantics<parallel>], iteration_bounds = array<i64: 1>, scalar_prefetch = 0 : i64, scratch_operands = 0 : i64, tpu.core_type = #tpu.core_type<tc>, window_params = [{transform_indices = @transform_0, window_bounds = array<i64: 4, 128>}, {transform_indices = @transform_1, window_bounds = array<i64: 4, 3>}, {transform_indices = @transform_2, window_bounds = array<i64: 3>}, {transform_indices = @transform_3, window_bounds = array<i64: 3, 128>}]} {
    %c0 = arith.constant 0 : index
    %c0_0 = arith.constant 0 : index
    %0 = vector.load %arg1[%c0, %c0_0] : memref<4x128xf32, #tpu.memory_space<vmem>>, vector<4x128xf32>
    %1 = vector.extract_strided_slice %0 {offsets = [0, 0], sizes = [1, 128], strides = [1, 1]} : vector<4x128xf32> to vector<1x128xf32>
    %c0_1 = arith.constant 0 : index
    %c0_2 = arith.constant 0 : index
    %2 = memref.load %arg2[%c0_1, %c0_2] : memref<4x3xf32, #tpu.memory_space<smem>>
    %3 = vector.broadcast %2 : f32 to vector<1x128xf32>
    %4 = arith.mulf %1, %3 : vector<1x128xf32>
    %5 = vector.extract_strided_slice %0 {offsets = [1, 0], sizes = [1, 128], strides = [1, 1]} : vector<4x128xf32> to vector<1x128xf32>
    %c1 = arith.constant 1 : index
    %c0_3 = arith.constant 0 : index
    %6 = memref.load %arg2[%c1, %c0_3] : memref<4x3xf32, #tpu.memory_space<smem>>
    %7 = vector.broadcast %6 : f32 to vector<1x128xf32>
    %8 = arith.mulf %5, %7 : vector<1x128xf32>
    %9 = arith.addf %4, %8 : vector<1x128xf32>
    %10 = vector.extract_strided_slice %0 {offsets = [2, 0], sizes = [1, 128], strides = [1, 1]} : vector<4x128xf32> to vector<1x128xf32>
    %c2 = arith.constant 2 : index
    %c0_4 = arith.constant 0 : index
    %11 = memref.load %arg2[%c2, %c0_4] : memref<4x3xf32, #tpu.memory_space<smem>>
    %12 = vector.broadcast %11 : f32 to vector<1x128xf32>
    %13 = arith.mulf %10, %12 : vector<1x128xf32>
    %14 = arith.addf %9, %13 : vector<1x128xf32>
    %15 = vector.extract_strided_slice %0 {offsets = [3, 0], sizes = [1, 128], strides = [1, 1]} : vector<4x128xf32> to vector<1x128xf32>
    %c3 = arith.constant 3 : index
    %c0_5 = arith.constant 0 : index
    %16 = memref.load %arg2[%c3, %c0_5] : memref<4x3xf32, #tpu.memory_space<smem>>
    %17 = vector.broadcast %16 : f32 to vector<1x128xf32>
    %18 = arith.mulf %15, %17 : vector<1x128xf32>
    %19 = arith.addf %14, %18 : vector<1x128xf32>
    %c0_6 = arith.constant 0 : index
    %20 = memref.load %arg3[%c0_6] : memref<3xf32, #tpu.memory_space<smem>>
    %21 = vector.broadcast %20 : f32 to vector<1x128xf32>
    %22 = arith.addf %19, %21 : vector<1x128xf32>
    %cst = arith.constant 0.000000e+00 : f32
    %23 = vector.broadcast %cst : f32 to vector<1x128xf32>
    %24 = arith.maximumf %22, %23 : vector<1x128xf32>
    %c0_7 = arith.constant 0 : index
    %c0_8 = arith.constant 0 : index
    %25 = vector.load %arg4[%c0_7, %c0_8] : memref<3x128xf32, #tpu.memory_space<vmem>>, vector<1x128xf32>
    tpu.vector_store %arg4[%c0_7, %c0_8], %24 {strides = array<i32>} : memref<3x128xf32, #tpu.memory_space<vmem>>, vector<1x128xf32>,
    %26 = vector.extract_strided_slice %0 {offsets = [0, 0], sizes = [1, 128], strides = [1, 1]} : vector<4x128xf32> to vector<1x128xf32>
    %c0_9 = arith.constant 0 : index
    %c1_10 = arith.constant 1 : index
    %27 = memref.load %arg2[%c0_9, %c1_10] : memref<4x3xf32, #tpu.memory_space<smem>>
    %28 = vector.broadcast %27 : f32 to vector<1x128xf32>
    %29 = arith.mulf %26, %28 : vector<1x128xf32>
    %30 = vector.extract_strided_slice %0 {offsets = [1, 0], sizes = [1, 128], strides = [1, 1]} : vector<4x128xf32> to vector<1x128xf32>
    %c1_11 = arith.constant 1 : index
    %c1_12 = arith.constant 1 : index
    %31 = memref.load %arg2[%c1_11, %c1_12] : memref<4x3xf32, #tpu.memory_space<smem>>
    %32 = vector.broadcast %31 : f32 to vector<1x128xf32>
    %33 = arith.mulf %30, %32 : vector<1x128xf32>
    %34 = arith.addf %29, %33 : vector<1x128xf32>
    %35 = vector.extract_strided_slice %0 {offsets = [2, 0], sizes = [1, 128], strides = [1, 1]} : vector<4x128xf32> to vector<1x128xf32>
    %c2_13 = arith.constant 2 : index
    %c1_14 = arith.constant 1 : index
    %36 = memref.load %arg2[%c2_13, %c1_14] : memref<4x3xf32, #tpu.memory_space<smem>>
    %37 = vector.broadcast %36 : f32 to vector<1x128xf32>
    %38 = arith.mulf %35, %37 : vector<1x128xf32>
    %39 = arith.addf %34, %38 : vector<1x128xf32>
    %40 = vector.extract_strided_slice %0 {offsets = [3, 0], sizes = [1, 128], strides = [1, 1]} : vector<4x128xf32> to vector<1x128xf32>
    %c3_15 = arith.constant 3 : index
    %c1_16 = arith.constant 1 : index
    %41 = memref.load %arg2[%c3_15, %c1_16] : memref<4x3xf32, #tpu.memory_space<smem>>
    %42 = vector.broadcast %41 : f32 to vector<1x128xf32>
    %43 = arith.mulf %40, %42 : vector<1x128xf32>
    %44 = arith.addf %39, %43 : vector<1x128xf32>
    %c1_17 = arith.constant 1 : index
    %45 = memref.load %arg3[%c1_17] : memref<3xf32, #tpu.memory_space<smem>>
    %46 = vector.broadcast %45 : f32 to vector<1x128xf32>
    %47 = arith.addf %44, %46 : vector<1x128xf32>
    %cst_18 = arith.constant 0.000000e+00 : f32
    %48 = vector.broadcast %cst_18 : f32 to vector<1x128xf32>
    %49 = arith.maximumf %47, %48 : vector<1x128xf32>
    %c1_19 = arith.constant 1 : index
    %c0_20 = arith.constant 0 : index
    %50 = vector.load %arg4[%c1_19, %c0_20] : memref<3x128xf32, #tpu.memory_space<vmem>>, vector<1x128xf32>
    tpu.vector_store %arg4[%c1_19, %c0_20], %49 {strides = array<i32>} : memref<3x128xf32, #tpu.memory_space<vmem>>, vector<1x128xf32>,
    %51 = vector.extract_strided_slice %0 {offsets = [0, 0], sizes = [1, 128], strides = [1, 1]} : vector<4x128xf32> to vector<1x128xf32>
    %c0_21 = arith.constant 0 : index
    %c2_22 = arith.constant 2 : index
    %52 = memref.load %arg2[%c0_21, %c2_22] : memref<4x3xf32, #tpu.memory_space<smem>>
    %53 = vector.broadcast %52 : f32 to vector<1x128xf32>
    %54 = arith.mulf %51, %53 : vector<1x128xf32>
    %55 = vector.extract_strided_slice %0 {offsets = [1, 0], sizes = [1, 128], strides = [1, 1]} : vector<4x128xf32> to vector<1x128xf32>
    %c1_23 = arith.constant 1 : index
    %c2_24 = arith.constant 2 : index
    %56 = memref.load %arg2[%c1_23, %c2_24] : memref<4x3xf32, #tpu.memory_space<smem>>
    %57 = vector.broadcast %56 : f32 to vector<1x128xf32>
    %58 = arith.mulf %55, %57 : vector<1x128xf32>
    %59 = arith.addf %54, %58 : vector<1x128xf32>
    %60 = vector.extract_strided_slice %0 {offsets = [2, 0], sizes = [1, 128], strides = [1, 1]} : vector<4x128xf32> to vector<1x128xf32>
    %c2_25 = arith.constant 2 : index
    %c2_26 = arith.constant 2 : index
    %61 = memref.load %arg2[%c2_25, %c2_26] : memref<4x3xf32, #tpu.memory_space<smem>>
    %62 = vector.broadcast %61 : f32 to vector<1x128xf32>
    %63 = arith.mulf %60, %62 : vector<1x128xf32>
    %64 = arith.addf %59, %63 : vector<1x128xf32>
    %65 = vector.extract_strided_slice %0 {offsets = [3, 0], sizes = [1, 128], strides = [1, 1]} : vector<4x128xf32> to vector<1x128xf32>
    %c3_27 = arith.constant 3 : index
    %c2_28 = arith.constant 2 : index
    %66 = memref.load %arg2[%c3_27, %c2_28] : memref<4x3xf32, #tpu.memory_space<smem>>
    %67 = vector.broadcast %66 : f32 to vector<1x128xf32>
    %68 = arith.mulf %65, %67 : vector<1x128xf32>
    %69 = arith.addf %64, %68 : vector<1x128xf32>
    %c2_29 = arith.constant 2 : index
    %70 = memref.load %arg3[%c2_29] : memref<3xf32, #tpu.memory_space<smem>>
    %71 = vector.broadcast %70 : f32 to vector<1x128xf32>
    %72 = arith.addf %69, %71 : vector<1x128xf32>
    %cst_30 = arith.constant 0.000000e+00 : f32
    %73 = vector.broadcast %cst_30 : f32 to vector<1x128xf32>
    %74 = arith.maximumf %72, %73 : vector<1x128xf32>
    %c2_31 = arith.constant 2 : index
    %c0_32 = arith.constant 0 : index
    %75 = vector.load %arg4[%c2_31, %c0_32] : memref<3x128xf32, #tpu.memory_space<vmem>>, vector<1x128xf32>
    tpu.vector_store %arg4[%c2_31, %c0_32], %74 {strides = array<i32>} : memref<3x128xf32, #tpu.memory_space<vmem>>, vector<1x128xf32>,
    return
  }
  func.func @transform_0(%arg0: i32) -> (i32, i32) {
    %c0_i32 = arith.constant 0 : i32
    %c0_i32_0 = arith.constant 0 : i32
    return %c0_i32, %arg0 : i32, i32
  }
  func.func @transform_1(%arg0: i32) -> (i32, i32) {
    %c0_i32 = arith.constant 0 : i32
    %c0_i32_0 = arith.constant 0 : i32
    %c0_i32_1 = arith.constant 0 : i32
    return %c0_i32, %c0_i32_0 : i32, i32
  }
  func.func @transform_2(%arg0: i32) -> i32 {
    %c0_i32 = arith.constant 0 : i32
    %c0_i32_0 = arith.constant 0 : i32
    return %c0_i32 : i32
  }
  func.func @transform_3(%arg0: i32) -> (i32, i32) {
    %c0_i32 = arith.constant 0 : i32
    %c0_i32_0 = arith.constant 0 : i32
    return %c0_i32, %arg0 : i32, i32
  }
}

</mosaic_0001>

<bundles_post_ra>
// kernel: tpu_custom_call.1
= control target key start
LH: loop header
LB: loop body
LE: loop exit
PB: predicated region body
PF: predicated region fallthrough
CT: control target
= control target key end

     0   :  { %8 = vsyncpa [#allocation3], 0  ;;  %s282_s0 = inlined_call_operand.hbm [shape: f32[4,128], index: 0, kind: input, shape index: {}]   ;;  %s283_s1 = inlined_call_operand.hbm [shape: f32[4,3], index: 1, kind: input, shape index: {}]   ;;  %s284_s2 = inlined_call_operand.vmem [shape: f32[3], index: 2, kind: input, shape index: {}]   ;;  %s285_s3 = inlined_call_operand.hbm [shape: f32[3,128], index: 3, kind: output, shape index: {}]  }
   0x1   :  { %9 = vsyncpa [#allocation5], 0 }
   0x2   :  { %10 = vsyncpa [#allocation6], 0 }
   0x3   :  { %11 = vsyncpa [#allocation4], 0  ;;  %s240_s12 = smov [#allocation2]   ;;  %s36_s16 = sshll.u32 %s284_s2, 4  ;;  %s37_s16 = int_to_ptr.vmem [resolvable:$true] %s36_s16 }
   0x4   :  { %s18_s13 = sshll.u32 %s240_s12, 4  ;;  %s19_s13 = int_to_ptr.vmem [resolvable:$true] %s18_s13 }
   0x5   :  { %s180_s17 = scalar_lea.vmem %s19_s13, 64  ;;  %p185_p1 = scmp.lt.s32.totalorder %s19_s13, %s19_s13 }
   0x6   :  { %p181_p0 = scmp.ne.s32.totalorder %s19_s13, %s180_s17  ;;  %p186_p2 = scmp.lt.s32.totalorder %s180_s17, %s180_s17 }
   0x8   :  { %p187_p3 = por %p186_p2, %p185_p1 }
   0xa   :  { %p188_p4 = pnand %p187_p3, %p181_p0 }
   0xc   :  { %191 = shalt.err (!%p188_p4)
}
   0xd   :  { %21 = dma.hbm_to_vmem [thread:$0]  %s282_s0, 64, %s19_s13, [#allocation3]  }
   0xe   :  { %s241_s20 = smov [#allocation7]   ;;  %s200_s23 = scalar_lea.vmem %s37_s16, 16 }
   0xf   :  { %29 = dma.hbm_to_smem %s283_s1, 64, %s241_s20, [#allocation5]  }
  0x10   :  { %p201_p5 = scmp.ne.s32.totalorder %s37_s16, %s200_s23  ;;  %p205_p6 = scmp.lt.s32.totalorder %s37_s16, %s37_s16 }
  0x11   :  { %p206_p7 = scmp.lt.s32.totalorder %s200_s23, %s200_s23 }
  0x13   :  { %p207_p8 = por %p206_p7, %p205_p6 }
  0x15   :  { %p208_p9 = pnand %p207_p8, %p201_p5 }
  0x17   :  { %211 = shalt.err (!%p208_p9)
}
  0x18   :  { %s242_s2 = smov [#allocation8]  }
  0x19   :  { %39 = dma.vmem_to_smem %s37_s16, 16, %s242_s2, [#allocation6]  }
  0x1a   :  { %232 = dma.done.wait [#allocation3], 64  }
  0x1b   :  { %233 = vsyncadd [#allocation3], 4294967232 }
  0x1c   :  { %234 = dma.done.wait [#allocation5], 64  }
  0x1d   :  { %235 = vsyncadd [#allocation5], 4294967232 }
  0x1e   :  { %236 = dma.done.wait [#allocation6], 16  }
  0x1f   :  { %237 = vsyncadd [#allocation6], 4294967280 }
  0x20   :  { %49 = sfence }
  0x21   :  { %s51_s0 = sld [smem:[#allocation7]]  ;;  %v50_v0 = vld [vmem:[#allocation2] sm:$0xf]  ;;  %s243_s10 = smov [#allocation9]  }
  0x22   :  { %s155_s24 = sld [smem:[#allocation7 + $0x80]]  ;;  %s144_s11 = sshll.u32 %s243_s10, 4  ;;  %s145_s11 = int_to_ptr.vmem [resolvable:$true] %s144_s11 }
  0x23   :  { %s156_s25 = sld [smem:[#allocation7 + $0x100]]  ;;  %s212_s12 = scalar_lea.vmem %s145_s11, 64 }
  0x24   :  { %s157_s1 = sld [smem:[#allocation7 + $0x180]]  ;;  %p213_p10 = scmp.ne.s32.totalorder %s145_s11, %s212_s12 }
  0x25   :  { %s273_s26 = sld [smem:[#allocation8]]  ;;  %p217_p11 = scmp.lt.s32.totalorder %s145_s11, %s145_s11 }
  0x26   :  { %s158_s27 = sld [smem:[#allocation7 + $0x1]]  ;;  %p218_p12 = scmp.lt.s32.totalorder %s212_s12, %s212_s12 }
  0x27   :  { %v52_v1 = vstv %s51_s0  ;;  %s159_s28 = sld [smem:[#allocation7 + $0x81]] }
  0x28   :  { %v55_v2 = vstv %s155_s24  ;;  %s160_s29 = sld [smem:[#allocation7 + $0x101]]  ;;  %v53_v3 = vmul.f32 %v52_v1, %v50_v0  ;;  %p219_p13 = por %p218_p12, %p217_p11 }
  0x29   :  { %v56_v4 = vmul.f32 %v55_v2, %v50_v0  ;;  %v62_v5 = vstv %s156_s25  ;;  %s161_s30 = sld [smem:[#allocation7 + $0x181]] }
  0x2a   :  { %v63_v6 = vmul.f32 %v62_v5, %v50_v0  ;;  %v69_v7 = vstv %s157_s1  ;;  %s275_s4 = sld [smem:[#allocation8 + $0x1]]  ;;  %p220_p0 = pnand %p219_p13, %p213_p10 }
  0x2b   :  { %v58_v8 = vrot.slane %v56_v4, 1  ;;  %v70_v9 = vmul.f32 %v69_v7, %v50_v0  ;;  %s163_s5 = sld [smem:[#allocation7 + $0x2]]  ;;  %v76_v21 = vstv %s273_s26 }
  0x2c   :  { %v65_v10 = vrot.slane %v63_v6, 2  ;;  %v81_v11 = vstv %s158_s27  ;;  %s164_s6 = sld [smem:[#allocation7 + $0x82]] }
  0x2d   :  { %v60_v12 = vadd.f32 %v58_v8, %v53_v3  ;;  %v72_v13 = vrot.slane %v70_v9, 3  ;;  %v84_v14 = vstv %s159_s28  ;;  %s165_s7 = sld [smem:[#allocation7 + $0x102]]  ;;  %v82_v15 = vmul.f32 %v81_v11, %v50_v0 }
  0x2e   :  { %v85_v16 = vmul.f32 %v84_v14, %v50_v0  ;;  %v91_v17 = vstv %s160_s29  ;;  %s166_s8 = sld [smem:[#allocation7 + $0x182]] }
  0x2f   :  { %v67_v18 = vadd.f32 %v65_v10, %v60_v12  ;;  %v92_v19 = vmul.f32 %v91_v17, %v50_v0  ;;  %v98_v20 = vstv %s161_s30  ;;  %s167_s9 = sld [smem:[#allocation8 + $0x2]] }
  0x30   :  { %v87_v22 = vrot.slane %v85_v16, 1  ;;  %v99_v23 = vmul.f32 %v98_v20, %v50_v0  ;;  %v105_v38 = vstv %s275_s4 }
  0x31   :  { %v74_v24 = vadd.f32 %v72_v13, %v67_v18  ;;  %v94_v25 = vrot.slane %v92_v19, 2  ;;  %v110_v26 = vstv %s163_s5 }
  0x32   :  { %v89_v27 = vadd.f32 %v87_v22, %v82_v15  ;;  %v101_v28 = vrot.slane %v99_v23, 3  ;;  %v113_v29 = vstv %s164_s6  ;;  %v111_v31 = vmul.f32 %v110_v26, %v50_v0 }
  0x33   :  { %v77_v30 = vadd.f32 %v76_v21, %v74_v24  ;;  %v114_v32 = vmul.f32 %v113_v29, %v50_v0  ;;  %v120_v33 = vstv %s165_s7 }
  0x34   :  { %v96_v34 = vadd.f32 %v94_v25, %v89_v27  ;;  %v121_v35 = vmul.f32 %v120_v33, %v50_v0  ;;  %v127_v36 = vstv %s166_s8 }
  0x35   :  { %v78_v37 = vmax.f32 %v77_v30, 0.0  ;;  %v116_v39 = vrot.slane %v114_v32, 1  ;;  %v128_v40 = vmul.f32 %v127_v36, %v50_v0  ;;  %v134_v48 = vstv %s167_s9 }
  0x36   :  { %v103_v41 = vadd.f32 %v101_v28, %v96_v34  ;;  %v123_v42 = vrot.slane %v121_v35, 2 }
  0x37   :  { %79 = vst [vmem:[#allocation9] sm:$0x1] %v78_v37  ;;  %v118_v43 = vadd.f32 %v116_v39, %v111_v31  ;;  %v130_v44 = vrot.slane %v128_v40, 3 }
  0x38   :  { %v106_v45 = vadd.f32 %v105_v38, %v103_v41 }
  0x39   :  { %v125_v46 = vadd.f32 %v123_v42, %v118_v43 }
  0x3a   :  { %v107_v47 = vmax.f32 %v106_v45, 0.0 }
  0x3b   :  { %v132_v49 = vadd.f32 %v130_v44, %v125_v46 }
  0x3c   :  { %108 = vst [vmem:[#allocation9 + $0x1] sm:$0x1] %v107_v47 }
  0x3d   :  { %v135_v50 = vadd.f32 %v134_v48, %v132_v49 }
  0x3f   :  { %v136_v51 = vmax.f32 %v135_v50, 0.0 }
  0x41   :  { %137 = vst [vmem:[#allocation9 + $0x2] sm:$0x1] %v136_v51 }
  0x42   :  { %223 = shalt.err (!%p220_p0)
}
  0x43   :  { %147 = dma.vmem_to_hbm [thread:$0]  %s145_s11, 64, %s285_s3, [#allocation4]  }
  0x44   :  { %238 = dma.done.wait [#allocation4], 64  }
  0x45   :  { %239 = vsyncadd [#allocation4], 4294967232 }
  0x46   :  { %151 = vsyncpa [#allocation3], 1 }
  0x47   :  { %152 = vsyncpa [#allocation4], 1 }
  0x48   :  { %153 = vsyncpa [#allocation5], 1 }
  0x49   :  { %154 = vsyncpa [#allocation6], 1 }

</bundles_post_ra>
